<compile_context>
chip_gen: v7x
topology: tpu7x:2x2x1
jax: 0.10.0
libtpu: 0.0.40
codegen_flags: <defaults>
</compile_context>

<pallas_src>
import functools

import jax
import jax.numpy as jnp
from jax import lax
from jax.experimental import pallas as pl
from jax.experimental.pallas import tpu as pltpu

_LANES = 128
_SUBLANES = 8
_TARGET_BLOCK_BYTES = 4 * 1024 * 1024   # per input per pipeline buffer (8192 rows f32)
_SPLIT_MIN_ELEMS = 2 * 1024 * 1024      # use 2 grid splits (v7x's 2 TCs) above this


def _sublane_pack(dtype):
    # Rows per sublane tile: f32 -> 8, bf16/f16 -> 16, int8/fp8 -> 32.
    return max(_SUBLANES, 32 // jnp.dtype(dtype).itemsize)


def _pearson_partial_kernel(p_ref, t_ref, o_ref, *, block_rows, rows_per_split, ragged):
    """Accumulate per-split sufficient statistics into the resident output block.

    o_ref block: (1, 5, 8, 128) f32, resident across the inner ("arbitrary") axis:
      [0] sum(p)  [1] sum(t)  [2] sum(p*t)  [3] sum(p*p)  [4] sum(t*t)
    """
    k = pl.program_id(1)

    @pl.when(k == 0)
    def _init():
        o_ref[...] = jnp.zeros_like(o_ref)

    # Stream native dtype from HBM; cast to f32 in-register.
    p = p_ref[...].astype(jnp.float32)
    t = t_ref[...].astype(jnp.float32)

    def accumulate(pv, tv):
        # (block_rows, 128) -> (block_rows//8, 8, 128): tile-aligned, free reshape.
        p3 = pv.reshape(block_rows // _SUBLANES, _SUBLANES, _LANES)
        t3 = tv.reshape(block_rows // _SUBLANES, _SUBLANES, _LANES)
        o_ref[0, 0] += jnp.sum(p3, axis=0)
        o_ref[0, 1] += jnp.sum(t3, axis=0)
        o_ref[0, 2] += jnp.sum(p3 * t3, axis=0)
        o_ref[0, 3] += jnp.sum(p3 * p3, axis=0)
        o_ref[0, 4] += jnp.sum(t3 * t3, axis=0)

    if ragged:
        # Only the last inner step overhangs the array; pay the mask only there.
        last = pl.num_programs(1) - 1

        @pl.when(k != last)
        def _full():
            accumulate(p, t)

        @pl.when(k == last)
        def _masked():
            row = lax.broadcasted_iota(jnp.int32, p.shape, 0) + k * block_rows
            valid = row < rows_per_split
            accumulate(jnp.where(valid, p, 0.0), jnp.where(valid, t, 0.0))
    else:
        accumulate(p, t)


def _stat_sums_jnp(p, t):
    p = p.astype(jnp.float32)
    t = t.astype(jnp.float32)
    return jnp.stack([p.sum(), t.sum(), (p * t).sum(), (p * p).sum(), (t * t).sum()])


def pearson_loss(preds, trues, eps=1e-8, *, block_rows_hint=None, num_splits_hint=None):
    """Pallas TPU implementation of PearsonLoss.forward (returns scalar f32)."""
    p = jnp.reshape(preds, (-1,))
    t = jnp.reshape(trues, (-1,))
    assert p.shape == t.shape, "preds/trues must have the same number of elements"
    n = int(p.shape[0])
    assert n > 0

    align_rows = max(_sublane_pack(p.dtype), _sublane_pack(t.dtype))
    if num_splits_hint is not None:
        num_splits = int(num_splits_hint)
    else:
        num_splits = 2 if n >= _SPLIT_MIN_ELEMS else 1   # 2 TCs on v7x; harmless on v5e/v6e
    chunk_elems = align_rows * _LANES * num_splits
    main_elems = (n // chunk_elems) * chunk_elems

    sums = jnp.zeros((5,), jnp.float32)

    if main_elems > 0:
        rows_per_split = main_elems // (_LANES * num_splits)
        itemsize = max(jnp.dtype(p.dtype).itemsize, jnp.dtype(t.dtype).itemsize)
        if block_rows_hint is not None:
            target_rows = int(block_rows_hint)
        else:
            target_rows = _TARGET_BLOCK_BYTES // (_LANES * itemsize)   # 8192 rows for f32
        target_rows = max(align_rows, (target_rows // align_rows) * align_rows)
        block_rows = min(rows_per_split, target_rows)
        steps = pl.cdiv(rows_per_split, block_rows)
        ragged = (rows_per_split % block_rows) != 0

        if main_elems == n:
            pm, tm = p, t          # fully aligned: free reshape, no copy at all
        else:
            # Aligned prefix goes through the kernel; the small tail is summed in
            # plain jnp below (no full-array pad).
            # TODO(synk): for fully copy-free unaligned inputs, move to
            # memory_space=pl.ANY + manual DMA so XLA never materializes this slice.
            pm, tm = p[:main_elems], t[:main_elems]
        pm = pm.reshape(num_splits, rows_per_split, _LANES)
        tm = tm.reshape(num_splits, rows_per_split, _LANES)

        kernel = functools.partial(
            _pearson_partial_kernel,
            block_rows=block_rows, rows_per_split=rows_per_split, ragged=ragged)

        # 2 inputs x 2 pipeline buffers + small resident output + margin.
        vmem_limit = (2 * block_rows * _LANES
                      * (jnp.dtype(p.dtype).itemsize + jnp.dtype(t.dtype).itemsize)
                      + (6 << 20))
        vmem_limit = max(int(vmem_limit), 16 << 20)

        partials = pl.pallas_call(
            kernel,
            out_shape=jax.ShapeDtypeStruct((num_splits, 5, _SUBLANES, _LANES), jnp.float32),
            grid_spec=pltpu.PrefetchScalarGridSpec(
                num_scalar_prefetch=0,
                grid=(num_splits, steps),
                in_specs=[
                    pl.BlockSpec((None, block_rows, _LANES), lambda s, k: (s, k, 0)),
                    pl.BlockSpec((None, block_rows, _LANES), lambda s, k: (s, k, 0)),
                ],
                out_specs=pl.BlockSpec((1, 5, _SUBLANES, _LANES),
                                       lambda s, k: (s, 0, 0, 0)),
            ),
            compiler_params=pltpu.CompilerParams(
                dimension_semantics=("parallel", "arbitrary"),
                vmem_limit_bytes=vmem_limit,
            ),
        )(pm, tm)
        sums = jnp.sum(partials, axis=(0, 2, 3))

    if main_elems < n:
        sums = sums + _stat_sums_jnp(p[main_elems:], t[main_elems:])

    # Single-pass formula == mean-centered PyTorch version; clamp variances at 0
    # to avoid NaN from f32 cancellation.  1/n computed on host in double precision.
    inv_n = jnp.float32(1.0 / float(n))
    sp, st, spt, spp, stt = sums[0], sums[1], sums[2], sums[3], sums[4]
    num = spt - sp * st * inv_n
    var_p = jnp.maximum(spp - sp * sp * inv_n, jnp.float32(0.0))
    var_t = jnp.maximum(stt - st * st * inv_n, jnp.float32(0.0))
    den = jnp.maximum(jnp.sqrt(var_p * var_t), jnp.float32(eps))
    return jnp.float32(1.0) - num / den


def _pearson_loss_ref(preds, trues, eps=1e-8):
    p = jnp.reshape(preds, (-1,)).astype(jnp.float32)
    t = jnp.reshape(trues, (-1,)).astype(jnp.float32)
    pm = p - jnp.mean(p)
    tm = t - jnp.mean(t)
    num = jnp.sum(pm * tm)
    den = jnp.maximum(jnp.sqrt(jnp.sum(pm ** 2) * jnp.sum(tm ** 2)), eps)
    return 1.0 - num / den


if __name__ == "__main__":
    key = jax.random.PRNGKey(0)
    kp, kt = jax.random.split(key)

    # Small NCHW-like tensors (the loss flattens them anyway): 2*4*16*16 = 2048 elems.
    preds = jax.random.normal(kp, (2, 4, 16, 16), dtype=jnp.float32)
    trues = 0.7 * preds + 0.3 * jax.random.normal(kt, (2, 4, 16, 16), dtype=jnp.float32)

    loss = pearson_loss(preds, trues)
    jax.block_until_ready(loss)
    ref = _pearson_loss_ref(preds, trues)
    assert jnp.allclose(loss, ref, atol=1e-5, rtol=1e-5), (loss, ref)

    # Exercise the multi-split (v7x megacore) and ragged-last-block paths cheaply.
    k2, k3 = jax.random.split(kt)
    a = jax.random.normal(k2, (40, 128), dtype=jnp.float32)            # 5120 elems
    b = 0.5 * a + jax.random.normal(k3, (40, 128), dtype=jnp.float32)
    r_ab = _pearson_loss_ref(a, b)
    l_split = pearson_loss(a, b, num_splits_hint=2)                    # 2 splits + jnp tail
    l_ragged = pearson_loss(a, b, block_rows_hint=16)                  # 40 % 16 != 0 -> masked last block
    assert jnp.allclose(l_split, r_ab, atol=1e-5, rtol=1e-5), (l_split, r_ab)
    assert jnp.allclose(l_ragged, r_ab, atol=1e-5, rtol=1e-5), (l_ragged, r_ab)

    # Unaligned size: tail handled in plain jnp (no full-array pad).
    c = jax.random.normal(k2, (3, 5, 7, 11), dtype=jnp.float32)        # 1155 elems
    d = 0.3 * c + jax.random.normal(k3, (3, 5, 7, 11), dtype=jnp.float32)
    l_unaligned = pearson_loss(c, d)
    r_cd = _pearson_loss_ref(c, d)
    assert jnp.allclose(l_unaligned, r_cd, atol=1e-5, rtol=1e-5), (l_unaligned, r_cd)

    print("KERNEL_OK")
</pallas_src>

<mosaic_0001>
module attributes {stable_mosaic.version = 11 : i64} {
  func.func @_pearson_partial_kernel(%arg0: i32, %arg1: i32, %arg2: memref<1x16x128xf32, #tpu.memory_space<vmem>>, %arg3: memref<1x16x128xf32, #tpu.memory_space<vmem>>, %arg4: memref<1x5x8x128xf32, #tpu.memory_space<vmem>>) attributes {dimension_semantics = [#tpu.dimension_semantics<parallel>, #tpu.dimension_semantics<arbitrary>], iteration_bounds = array<i64: 1, 1>, scalar_prefetch = 0 : i64, scratch_operands = 0 : i64, tpu.core_type = #tpu.core_type<tc>, window_params = [{transform_indices = @transform_0, window_bounds = array<i64: 1, 16, 128>}, {transform_indices = @transform_1, window_bounds = array<i64: 1, 16, 128>}, {transform_indices = @transform_2, window_bounds = array<i64: 1, 5, 8, 128>}]} {
    %c0_i32 = arith.constant 0 : i32
    %0 = arith.cmpi eq, %arg1, %c0_i32 : i32
    %1 = arith.extui %0 : i1 to i32
    %c0_i32_0 = arith.constant 0 : i32
    %2 = arith.cmpi ne, %1, %c0_i32_0 : i32
    scf.if %2 {
      %cst_46 = arith.constant 0.000000e+00 : f32
      %47 = vector.broadcast %cst_46 : f32 to vector<1x5x8x128xf32>
      %c0_47 = arith.constant 0 : index
      %c0_48 = arith.constant 0 : index
      %c0_49 = arith.constant 0 : index
      %c0_50 = arith.constant 0 : index
      %48 = vector.load %arg4[%c0_47, %c0_48, %c0_49, %c0_50] : memref<1x5x8x128xf32, #tpu.memory_space<vmem>>, vector<1x5x8x128xf32>
      tpu.vector_store %arg4[%c0_47, %c0_48, %c0_49, %c0_50], %47 {strides = array<i32>} : memref<1x5x8x128xf32, #tpu.memory_space<vmem>>, vector<1x5x8x128xf32>,
    } else {
    }
    %c0 = arith.constant 0 : index
    %c0_1 = arith.constant 0 : index
    %c0_2 = arith.constant 0 : index
    %3 = vector.load %arg2[%c0, %c0_1, %c0_2] : memref<1x16x128xf32, #tpu.memory_space<vmem>>, vector<1x16x128xf32>
    %4 = vector.shape_cast %3 : vector<1x16x128xf32> to vector<16x128xf32>
    %c0_3 = arith.constant 0 : index
    %c0_4 = arith.constant 0 : index
    %c0_5 = arith.constant 0 : index
    %5 = vector.load %arg3[%c0_3, %c0_4, %c0_5] : memref<1x16x128xf32, #tpu.memory_space<vmem>>, vector<1x16x128xf32>
    %6 = vector.shape_cast %5 : vector<1x16x128xf32> to vector<16x128xf32>
    %7 = vector.shape_cast %4 : vector<16x128xf32> to vector<2x8x128xf32>
    %8 = vector.shape_cast %6 : vector<16x128xf32> to vector<2x8x128xf32>
    %c0_6 = arith.constant 0 : index
    %c0_7 = arith.constant 0 : index
    %c0_8 = arith.constant 0 : index
    %c0_9 = arith.constant 0 : index
    %9 = vector.load %arg4[%c0_6, %c0_7, %c0_8, %c0_9] : memref<1x5x8x128xf32, #tpu.memory_space<vmem>>, vector<1x1x8x128xf32>
    %10 = vector.shape_cast %9 : vector<1x1x8x128xf32> to vector<8x128xf32>
    %cst = arith.constant dense<0.000000e+00> : vector<8x128xf32>
    %11 = vector.multi_reduction <add>, %7, %cst [0] : vector<2x8x128xf32> to vector<8x128xf32>
    %12 = arith.addf %10, %11 : vector<8x128xf32>
    %c0_10 = arith.constant 0 : index
    %c0_11 = arith.constant 0 : index
    %c0_12 = arith.constant 0 : index
    %c0_13 = arith.constant 0 : index
    %13 = vector.load %arg4[%c0_10, %c0_11, %c0_12, %c0_13] : memref<1x5x8x128xf32, #tpu.memory_space<vmem>>, vector<1x1x8x128xf32>
    %14 = vector.shape_cast %13 : vector<1x1x8x128xf32> to vector<8x128xf32>
    %15 = vector.shape_cast %12 : vector<8x128xf32> to vector<1x1x8x128xf32>
    tpu.vector_store %arg4[%c0_10, %c0_11, %c0_12, %c0_13], %15 {strides = array<i32>} : memref<1x5x8x128xf32, #tpu.memory_space<vmem>>, vector<1x1x8x128xf32>,
    %c0_14 = arith.constant 0 : index
    %c1 = arith.constant 1 : index
    %c0_15 = arith.constant 0 : index
    %c0_16 = arith.constant 0 : index
    %16 = vector.load %arg4[%c0_14, %c1, %c0_15, %c0_16] : memref<1x5x8x128xf32, #tpu.memory_space<vmem>>, vector<1x1x8x128xf32>
    %17 = vector.shape_cast %16 : vector<1x1x8x128xf32> to vector<8x128xf32>
    %cst_17 = arith.constant dense<0.000000e+00> : vector<8x128xf32>
    %18 = vector.multi_reduction <add>, %8, %cst_17 [0] : vector<2x8x128xf32> to vector<8x128xf32>
    %19 = arith.addf %17, %18 : vector<8x128xf32>
    %c0_18 = arith.constant 0 : index
    %c1_19 = arith.constant 1 : index
    %c0_20 = arith.constant 0 : index
    %c0_21 = arith.constant 0 : index
    %20 = vector.load %arg4[%c0_18, %c1_19, %c0_20, %c0_21] : memref<1x5x8x128xf32, #tpu.memory_space<vmem>>, vector<1x1x8x128xf32>
    %21 = vector.shape_cast %20 : vector<1x1x8x128xf32> to vector<8x128xf32>
    %22 = vector.shape_cast %19 : vector<8x128xf32> to vector<1x1x8x128xf32>
    tpu.vector_store %arg4[%c0_18, %c1_19, %c0_20, %c0_21], %22 {strides = array<i32>} : memref<1x5x8x128xf32, #tpu.memory_space<vmem>>, vector<1x1x8x128xf32>,
    %c0_22 = arith.constant 0 : index
    %c2 = arith.constant 2 : index
    %c0_23 = arith.constant 0 : index
    %c0_24 = arith.constant 0 : index
    %23 = vector.load %arg4[%c0_22, %c2, %c0_23, %c0_24] : memref<1x5x8x128xf32, #tpu.memory_space<vmem>>, vector<1x1x8x128xf32>
    %24 = vector.shape_cast %23 : vector<1x1x8x128xf32> to vector<8x128xf32>
    %25 = arith.mulf %7, %8 : vector<2x8x128xf32>
    %cst_25 = arith.constant dense<0.000000e+00> : vector<8x128xf32>
    %26 = vector.multi_reduction <add>, %25, %cst_25 [0] : vector<2x8x128xf32> to vector<8x128xf32>
    %27 = arith.addf %24, %26 : vector<8x128xf32>
    %c0_26 = arith.constant 0 : index
    %c2_27 = arith.constant 2 : index
    %c0_28 = arith.constant 0 : index
    %c0_29 = arith.constant 0 : index
    %28 = vector.load %arg4[%c0_26, %c2_27, %c0_28, %c0_29] : memref<1x5x8x128xf32, #tpu.memory_space<vmem>>, vector<1x1x8x128xf32>
    %29 = vector.shape_cast %28 : vector<1x1x8x128xf32> to vector<8x128xf32>
    %30 = vector.shape_cast %27 : vector<8x128xf32> to vector<1x1x8x128xf32>
    tpu.vector_store %arg4[%c0_26, %c2_27, %c0_28, %c0_29], %30 {strides = array<i32>} : memref<1x5x8x128xf32, #tpu.memory_space<vmem>>, vector<1x1x8x128xf32>,
    %c0_30 = arith.constant 0 : index
    %c3 = arith.constant 3 : index
    %c0_31 = arith.constant 0 : index
    %c0_32 = arith.constant 0 : index
    %31 = vector.load %arg4[%c0_30, %c3, %c0_31, %c0_32] : memref<1x5x8x128xf32, #tpu.memory_space<vmem>>, vector<1x1x8x128xf32>
    %32 = vector.shape_cast %31 : vector<1x1x8x128xf32> to vector<8x128xf32>
    %33 = arith.mulf %7, %7 : vector<2x8x128xf32>
    %cst_33 = arith.constant dense<0.000000e+00> : vector<8x128xf32>
    %34 = vector.multi_reduction <add>, %33, %cst_33 [0] : vector<2x8x128xf32> to vector<8x128xf32>
    %35 = arith.addf %32, %34 : vector<8x128xf32>
    %c0_34 = arith.constant 0 : index
    %c3_35 = arith.constant 3 : index
    %c0_36 = arith.constant 0 : index
    %c0_37 = arith.constant 0 : index
    %36 = vector.load %arg4[%c0_34, %c3_35, %c0_36, %c0_37] : memref<1x5x8x128xf32, #tpu.memory_space<vmem>>, vector<1x1x8x128xf32>
    %37 = vector.shape_cast %36 : vector<1x1x8x128xf32> to vector<8x128xf32>
    %38 = vector.shape_cast %35 : vector<8x128xf32> to vector<1x1x8x128xf32>
    tpu.vector_store %arg4[%c0_34, %c3_35, %c0_36, %c0_37], %38 {strides = array<i32>} : memref<1x5x8x128xf32, #tpu.memory_space<vmem>>, vector<1x1x8x128xf32>,
    %c0_38 = arith.constant 0 : index
    %c4 = arith.constant 4 : index
    %c0_39 = arith.constant 0 : index
    %c0_40 = arith.constant 0 : index
    %39 = vector.load %arg4[%c0_38, %c4, %c0_39, %c0_40] : memref<1x5x8x128xf32, #tpu.memory_space<vmem>>, vector<1x1x8x128xf32>
    %40 = vector.shape_cast %39 : vector<1x1x8x128xf32> to vector<8x128xf32>
    %41 = arith.mulf %8, %8 : vector<2x8x128xf32>
    %cst_41 = arith.constant dense<0.000000e+00> : vector<8x128xf32>
    %42 = vector.multi_reduction <add>, %41, %cst_41 [0] : vector<2x8x128xf32> to vector<8x128xf32>
    %43 = arith.addf %40, %42 : vector<8x128xf32>
    %c0_42 = arith.constant 0 : index
    %c4_43 = arith.constant 4 : index
    %c0_44 = arith.constant 0 : index
    %c0_45 = arith.constant 0 : index
    %44 = vector.load %arg4[%c0_42, %c4_43, %c0_44, %c0_45] : memref<1x5x8x128xf32, #tpu.memory_space<vmem>>, vector<1x1x8x128xf32>
    %45 = vector.shape_cast %44 : vector<1x1x8x128xf32> to vector<8x128xf32>
    %46 = vector.shape_cast %43 : vector<8x128xf32> to vector<1x1x8x128xf32>
    tpu.vector_store %arg4[%c0_42, %c4_43, %c0_44, %c0_45], %46 {strides = array<i32>} : memref<1x5x8x128xf32, #tpu.memory_space<vmem>>, vector<1x1x8x128xf32>,
    return
  }
  func.func @transform_0(%arg0: i32, %arg1: i32) -> (i32, i32, i32) {
    %c0_i32 = arith.constant 0 : i32
    %c0_i32_0 = arith.constant 0 : i32
    return %arg0, %arg1, %c0_i32 : i32, i32, i32
  }
  func.func @transform_1(%arg0: i32, %arg1: i32) -> (i32, i32, i32) {
    %c0_i32 = arith.constant 0 : i32
    %c0_i32_0 = arith.constant 0 : i32
    return %arg0, %arg1, %c0_i32 : i32, i32, i32
  }
  func.func @transform_2(%arg0: i32, %arg1: i32) -> (i32, i32, i32, i32) {
    %c0_i32 = arith.constant 0 : i32
    %c0_i32_0 = arith.constant 0 : i32
    %c0_i32_1 = arith.constant 0 : i32
    %c0_i32_2 = arith.constant 0 : i32
    return %arg0, %c0_i32, %c0_i32_0, %c0_i32_1 : i32, i32, i32, i32
  }
}

</mosaic_0001>

<bundles_post_ra>
// kernel: tpu_custom_call.1
= control target key start
LH: loop header
LB: loop body
LE: loop exit
PB: predicated region body
PF: predicated region fallthrough
CT: control target
= control target key end

     0   :  { %7 = vsyncpa [#allocation3], 0  ;;  %s244_s0 = inlined_call_operand.hbm [shape: f32[1,16,128], index: 0, kind: input, shape index: {}]   ;;  %s245_s1 = inlined_call_operand.hbm [shape: f32[1,16,128], index: 1, kind: input, shape index: {}]   ;;  %s246_s2 = inlined_call_operand.hbm [shape: f32[1,5,8,128], index: 2, kind: output, shape index: {}]  }
   0x1   :  { %8 = vsyncpa [#allocation6], 0 }
   0x2   :  { %9 = vsyncpa [#allocation4], 0  ;;  %s179_s9 = smov [#allocation2]   ;;  %s107_s13 = scalar_lea.hbm %s244_s0, 256 }
   0x3   :  { %s15_s10 = sshll.u32 %s179_s9, 4  ;;  %p108_p0 = scmp.ne.s32.totalorder %s244_s0, %s107_s13  ;;  %s16_s10 = int_to_ptr.vmem [resolvable:$true] %s15_s10 }
   0x4   :  { %p111_p1 = scmp.lt.u32.totalorder %s107_s13, %s244_s0 }
   0x6   :  { %p113_p2 = pnand %p111_p1, %p108_p0 }
   0x8   :  { %116 = shalt.err (!%p113_p2)
}
   0x9   :  { %s117_s18 = scalar_lea.vmem %s16_s10, 256  ;;  %p122_p4 = scmp.lt.s32.totalorder %s16_s10, %s16_s10 }
   0xa   :  { %p118_p3 = scmp.ne.s32.totalorder %s16_s10, %s117_s18  ;;  %p123_p5 = scmp.lt.s32.totalorder %s117_s18, %s117_s18 }
   0xc   :  { %p124_p6 = por %p123_p5, %p122_p4 }
   0xe   :  { %p125_p7 = pnand %p124_p6, %p118_p3 }
  0x10   :  { %128 = shalt.err (!%p125_p7)
}
  0x11   :  { %s180_s19 = smov 128   ;;  %s181_s20 = smov 8  }
  0x12   :  { %21 = dma.hbm_to_vmem [thread:$0]  %s244_s0, 256, %s16_s10, [#allocation3], %s180_s19, %s180_s19, %s181_s20  }
  0x13   :  { %s182_s23 = smov [#allocation5]   ;;  %s129_s27 = scalar_lea.hbm %s245_s1, 256 }
  0x14   :  { %s27_s24 = sshll.u32 %s182_s23, 4  ;;  %p130_p8 = scmp.ne.s32.totalorder %s245_s1, %s129_s27  ;;  %s28_s24 = int_to_ptr.vmem [resolvable:$true] %s27_s24 }
  0x15   :  { %p133_p9 = scmp.lt.u32.totalorder %s129_s27, %s245_s1 }
  0x17   :  { %p135_p10 = pnand %p133_p9, %p130_p8 }
  0x19   :  { %138 = shalt.err (!%p135_p10)
}
  0x1a   :  { %s139_s4 = scalar_lea.vmem %s28_s24, 256  ;;  %p144_p12 = scmp.lt.s32.totalorder %s28_s24, %s28_s24 }
  0x1b   :  { %p140_p11 = scmp.ne.s32.totalorder %s28_s24, %s139_s4  ;;  %p145_p13 = scmp.lt.s32.totalorder %s139_s4, %s139_s4 }
  0x1d   :  { %p146_p0 = por %p145_p13, %p144_p12 }
  0x1f   :  { %p147_p1 = pnand %p146_p0, %p140_p11 }
  0x21   :  { %150 = shalt.err (!%p147_p1)
}
  0x22   :  { %33 = dma.hbm_to_vmem [thread:$0]  %s245_s1, 256, %s28_s24, [#allocation6], %s180_s19, %s180_s19, %s181_s20  }
  0x23   :  { %173 = dma.done.wait [#allocation3], 256  }
  0x24   :  { %174 = vsyncadd [#allocation3], 4294967040 }
  0x25   :  { %175 = dma.done.wait [#allocation6], 256  }
  0x26   :  { %176 = vsyncadd [#allocation6], 4294967040  ;;  %v49_v0 = vld [vmem:[#allocation2] sm:$0xff]  ;;  %v50_v1 = vld [vmem:[#allocation2 + $0x8] sm:$0xff]  ;;  %s183_s6 = smov [#allocation7]  }
  0x27   :  { %v51_v2 = vld [vmem:[#allocation5] sm:$0xff]  ;;  %v54_v3 = vadd.f32 %v50_v1, %v49_v0  ;;  %v52_v4 = vld [vmem:[#allocation5 + $0x8] sm:$0xff]  ;;  %v71_v6 = vmul.f32 %v49_v0, %v49_v0  ;;  %v72_v7 = vmul.f32 %v50_v1, %v50_v1  ;;  %s88_s7 = sshll.u32 %s183_s6, 4  ;;  %s89_s7 = int_to_ptr.vmem [resolvable:$true] %s88_s7 }
  0x28   :  { %v64_v5 = vmul.f32 %v51_v2, %v49_v0  ;;  %v59_v8 = vadd.f32 %v52_v4, %v51_v2  ;;  %v65_v9 = vmul.f32 %v52_v4, %v50_v1  ;;  %v78_v10 = vmul.f32 %v51_v2, %v51_v2  ;;  %s151_s1 = scalar_lea.vmem %s89_s7, 640  ;;  %p156_p3 = scmp.lt.s32.totalorder %s89_s7, %s89_s7 }
  0x29   :  { %v79_v11 = vmul.f32 %v52_v4, %v52_v4  ;;  %v73_v12 = vadd.f32 %v72_v7, %v71_v6  ;;  %56 = vst [vmem:[#allocation7] sm:$0xff] %v54_v3  ;;  %p152_p2 = scmp.ne.s32.totalorder %s89_s7, %s151_s1  ;;  %p157_p4 = scmp.lt.s32.totalorder %s151_s1, %s151_s1 }
  0x2a   :  { %v66_v13 = vadd.f32 %v65_v9, %v64_v5  ;;  %61 = vst [vmem:[#allocation7 + $0x8] sm:$0xff] %v59_v8 }
  0x2b   :  { %v80_v14 = vadd.f32 %v79_v11, %v78_v10  ;;  %75 = vst [vmem:[#allocation7 + $0x18] sm:$0xff] %v73_v12  ;;  %p158_p5 = por %p157_p4, %p156_p3 }
  0x2c   :  { %68 = vst [vmem:[#allocation7 + $0x10] sm:$0xff] %v66_v13 }
  0x2d   :  { %82 = vst [vmem:[#allocation7 + $0x20] sm:$0xff] %v80_v14  ;;  %p159_p6 = pnand %p158_p5, %p152_p2 }
  0x2f   :  { %162 = shalt.err (!%p159_p6)
}
  0x30   :  { %s163_s10 = scalar_lea.hbm %s246_s2, 640 }
  0x31   :  { %p164_p7 = scmp.ne.s32.totalorder %s246_s2, %s163_s10  ;;  %p167_p8 = scmp.lt.u32.totalorder %s163_s10, %s246_s2 }
  0x33   :  { %p169_p9 = pnand %p167_p8, %p164_p7 }
  0x35   :  { %172 = shalt.err (!%p169_p9)
}
  0x36   :  { %94 = dma.vmem_to_hbm [thread:$0]  %s89_s7, 640, %s246_s2, [#allocation4], %s180_s19, %s180_s19, %s181_s20  }
  0x37   :  { %177 = dma.done.wait [#allocation4], 640  }
  0x38   :  { %178 = vsyncadd [#allocation4], 4294966656 }
  0x39   :  { %98 = vsyncpa [#allocation3], 1 }
  0x3a   :  { %99 = vsyncpa [#allocation6], 1 }
  0x3b   :  { %100 = vsyncpa [#allocation4], 1 }

</bundles_post_ra>
